<compile_context>
chip_gen: v7x
topology: tpu7x:2x2x1
jax: 0.10.0
libtpu: 0.0.40
codegen_flags: <defaults>
</compile_context>

<pallas_src>
import jax
import jax.numpy as jnp
from jax.experimental import pallas as pl
from jax.experimental.pallas import tpu as pltpu

_LANE = 128
_NEG_LARGE = -1e30  # pad-lane logit bias -> exp() underflows to exactly 0


def _round_up(n, m):
    return ((n + m - 1) // m) * m


def actor_forward_kernel(x_ref, w1_ref, b1_ref, w2_ref, b2_ref, w3_ref, b3_ref,
                         probs_ref):
    # Layer 1: Linear + ReLU  (matmul in compute dtype, accumulate/elementwise in f32)
    h1 = jnp.dot(x_ref[...], w1_ref[...], preferred_element_type=jnp.float32)
    h1 = jnp.maximum(h1 + b1_ref[...], 0.0)
    # Layer 2: Linear + ReLU
    h2 = jnp.dot(h1.astype(w2_ref.dtype), w2_ref[...],
                 preferred_element_type=jnp.float32)
    h2 = jnp.maximum(h2 + b2_ref[...], 0.0)
    # Layer 3: Linear -> logits (padded to 128 lanes; pad lanes get _NEG_LARGE bias)
    logits = jnp.dot(h2.astype(w3_ref.dtype), w3_ref[...],
                     preferred_element_type=jnp.float32) + b3_ref[...]
    # Categorical(logits).probs == numerically-stable softmax over the last axis.
    m = jnp.max(logits, axis=-1, keepdims=True)
    e = jnp.exp(logits - m)                      # pad lanes -> 0
    denom = jnp.sum(e, axis=-1, keepdims=True)
    probs_ref[...] = e * pl.reciprocal(denom, approx=True)


def actor_forward(x, params, *, use_bf16=True, block_b=None):
    """x: [B, n_features] float32 -> [B, n_actions] action probabilities."""
    w1, b1, w2, b2, w3, b3 = params
    B, n_features = x.shape
    hidden = w1.shape[1]
    n_actions = w3.shape[1]

    # --- lane-dense output: pad the action dim up to a multiple of 128 lanes ---
    n_pad = _round_up(max(n_actions, _LANE), _LANE)
    w3p = jnp.zeros((hidden, n_pad), jnp.float32).at[:, :n_actions].set(
        w3.astype(jnp.float32))
    b3p = jnp.full((1, n_pad), _NEG_LARGE, jnp.float32).at[:, :n_actions].set(
        b3.reshape(1, -1).astype(jnp.float32))

    # --- compute dtype for the MXU (bf16 native on v6e/v7x; f32 accumulation) ---
    compute_dtype = jnp.bfloat16 if use_bf16 else jnp.float32
    xk = x.astype(compute_dtype)
    w1k = w1.astype(compute_dtype)
    w2k = w2.astype(compute_dtype)
    w3k = w3p.astype(compute_dtype)
    b1k = b1.reshape(1, -1).astype(jnp.float32)
    b2k = b2.reshape(1, -1).astype(jnp.float32)

    # --- batch tiling: grid over rows, weights resident across steps ---
    if block_b is None:
        block_b = min(2048, _round_up(B, 16))
    block_b = _round_up(block_b, 16)          # sublane-friendly for f32 and bf16
    b_pad = _round_up(B, block_b)
    if b_pad != B:
        xk = jnp.pad(xk, ((0, b_pad - B), (0, 0)))
    grid = (b_pad // block_b,)

    def resident(shape):
        return pl.BlockSpec(shape, lambda i: (0, 0))

    probs_padded = pl.pallas_call(
        actor_forward_kernel,
        out_shape=jax.ShapeDtypeStruct((b_pad, n_pad), jnp.float32),
        grid=grid,
        in_specs=[
            pl.BlockSpec((block_b, n_features), lambda i: (i, 0)),  # x tile
            resident((n_features, hidden)),                         # w1
            resident((1, hidden)),                                  # b1
            resident((hidden, hidden)),                             # w2
            resident((1, hidden)),                                  # b2
            resident((hidden, n_pad)),                              # w3 (padded)
            resident((1, n_pad)),                                   # b3 (padded)
        ],
        out_specs=pl.BlockSpec((block_b, n_pad), lambda i: (i, 0)),
        compiler_params=pltpu.CompilerParams(
            dimension_semantics=("parallel",)),
    )(xk, w1k, b1k, w2k, b2k, w3k, b3p)

    return probs_padded[:B, :n_actions]


def init_actor_params(key, n_features, n_actions, hidden=64):
    """Deterministic init mirroring torch.nn.Linear default (U(-1/sqrt(fan_in), +))."""
    ks = jax.random.split(key, 6)

    def linear(kw, kb, fan_in, fan_out):
        bound = 1.0 / jnp.sqrt(jnp.float32(fan_in))
        w = jax.random.uniform(kw, (fan_in, fan_out), jnp.float32, -bound, bound)
        b = jax.random.uniform(kb, (1, fan_out), jnp.float32, -bound, bound)
        return w, b

    w1, b1 = linear(ks[0], ks[1], n_features, hidden)
    w2, b2 = linear(ks[2], ks[3], hidden, hidden)
    w3, b3 = linear(ks[4], ks[5], hidden, n_actions)
    return (w1, b1, w2, b2, w3, b3)


def actor_forward_ref(x, params):
    """Pure-JAX f32 reference for correctness checking."""
    w1, b1, w2, b2, w3, b3 = params
    h1 = jnp.maximum(x @ w1 + b1, 0.0)
    h2 = jnp.maximum(h1 @ w2 + b2, 0.0)
    logits = h2 @ w3 + b3
    return jax.nn.softmax(logits, axis=-1)


# TODO(synk): act()/train()/Adam optimizer/save-load are training-side utilities,
# not part of the forward pass, and are intentionally not ported to Pallas.

if __name__ == "__main__":
    key = jax.random.PRNGKey(0)
    k_params, k_x = jax.random.split(key)

    BATCH = 48          # small test batch; block_b=16 exercises a 3-step grid
    N_FEATURES = 16
    N_ACTIONS = 8

    params = init_actor_params(k_params, N_FEATURES, N_ACTIONS, hidden=64)
    x = jax.random.normal(k_x, (BATCH, N_FEATURES), dtype=jnp.float32)

    ref = actor_forward_ref(x, params)

    # f32-MXU path (exact inputs; tolerance loosened only for approx reciprocal)
    probs_f32 = jax.block_until_ready(
        actor_forward(x, params, use_bf16=False, block_b=16))
    assert probs_f32.shape == (BATCH, N_ACTIONS)
    assert jnp.allclose(probs_f32, ref, atol=5e-3, rtol=5e-3)
    assert jnp.allclose(jnp.sum(probs_f32, axis=-1), 1.0, atol=5e-3)

    # bf16-MXU path (default; native matmul dtype on v6e/v7x)
    probs_bf16 = jax.block_until_ready(
        actor_forward(x, params, use_bf16=True, block_b=16))
    assert probs_bf16.shape == (BATCH, N_ACTIONS)
    assert jnp.allclose(probs_bf16, ref, atol=2e-2, rtol=2e-2)
    assert jnp.allclose(jnp.sum(probs_bf16, axis=-1), 1.0, atol=2e-2)

    print("KERNEL_OK")
</pallas_src>

<mosaic_0001>
module attributes {stable_mosaic.version = 11 : i64} {
  func.func @actor_forward_kernel(%arg0: i32, %arg1: memref<16x16xf32, #tpu.memory_space<vmem>>, %arg2: memref<16x64xf32, #tpu.memory_space<vmem>>, %arg3: memref<1x64xf32, #tpu.memory_space<vmem>>, %arg4: memref<64x64xf32, #tpu.memory_space<vmem>>, %arg5: memref<1x64xf32, #tpu.memory_space<vmem>>, %arg6: memref<64x128xf32, #tpu.memory_space<vmem>>, %arg7: memref<1x128xf32, #tpu.memory_space<vmem>>, %arg8: memref<16x128xf32, #tpu.memory_space<vmem>>) attributes {dimension_semantics = [#tpu.dimension_semantics<parallel>], iteration_bounds = array<i64: 3>, scalar_prefetch = 0 : i64, scratch_operands = 0 : i64, tpu.core_type = #tpu.core_type<tc>, window_params = [{transform_indices = @transform_0, window_bounds = array<i64: 16, 16>}, {pipeline_mode = #tpu.pipeline_mode<synchronous>, transform_indices = @transform_1, window_bounds = array<i64: 16, 64>}, {pipeline_mode = #tpu.pipeline_mode<synchronous>, transform_indices = @transform_2, window_bounds = array<i64: 1, 64>}, {pipeline_mode = #tpu.pipeline_mode<synchronous>, transform_indices = @transform_3, window_bounds = array<i64: 64, 64>}, {pipeline_mode = #tpu.pipeline_mode<synchronous>, transform_indices = @transform_4, window_bounds = array<i64: 1, 64>}, {pipeline_mode = #tpu.pipeline_mode<synchronous>, transform_indices = @transform_5, window_bounds = array<i64: 64, 128>}, {pipeline_mode = #tpu.pipeline_mode<synchronous>, transform_indices = @transform_6, window_bounds = array<i64: 1, 128>}, {transform_indices = @transform_7, window_bounds = array<i64: 16, 128>}]} {
    %c0 = arith.constant 0 : index
    %c0_0 = arith.constant 0 : index
    %0 = vector.load %arg1[%c0, %c0_0] : memref<16x16xf32, #tpu.memory_space<vmem>>, vector<16x16xf32>
    %c0_1 = arith.constant 0 : index
    %c0_2 = arith.constant 0 : index
    %1 = vector.load %arg2[%c0_1, %c0_2] : memref<16x64xf32, #tpu.memory_space<vmem>>, vector<16x64xf32>
    %cst = arith.constant dense<0.000000e+00> : vector<16x64xf32>
    %2 = tpu.matmul %0, %1, %cst {dimension_numbers = #tpu.dot_dimension_numbers<[1], [0], [0], [1], [0, 0, 1, 1], [], []>} : vector<16x16xf32>, vector<16x64xf32>, vector<16x64xf32> -> vector<16x64xf32>
    %c0_3 = arith.constant 0 : index
    %c0_4 = arith.constant 0 : index
    %3 = vector.load %arg3[%c0_3, %c0_4] : memref<1x64xf32, #tpu.memory_space<vmem>>, vector<1x64xf32>
    %4 = vector.broadcast %3 : vector<1x64xf32> to vector<16x64xf32>
    %5 = arith.addf %2, %4 : vector<16x64xf32>
    %cst_5 = arith.constant 0.000000e+00 : f32
    %6 = vector.broadcast %cst_5 : f32 to vector<16x64xf32>
    %7 = arith.maximumf %5, %6 : vector<16x64xf32>
    %c0_6 = arith.constant 0 : index
    %c0_7 = arith.constant 0 : index
    %8 = vector.load %arg4[%c0_6, %c0_7] : memref<64x64xf32, #tpu.memory_space<vmem>>, vector<64x64xf32>
    %cst_8 = arith.constant dense<0.000000e+00> : vector<16x64xf32>
    %9 = tpu.matmul %7, %8, %cst_8 {dimension_numbers = #tpu.dot_dimension_numbers<[1], [0], [0], [1], [0, 0, 1, 1], [], []>} : vector<16x64xf32>, vector<64x64xf32>, vector<16x64xf32> -> vector<16x64xf32>
    %c0_9 = arith.constant 0 : index
    %c0_10 = arith.constant 0 : index
    %10 = vector.load %arg5[%c0_9, %c0_10] : memref<1x64xf32, #tpu.memory_space<vmem>>, vector<1x64xf32>
    %11 = vector.broadcast %10 : vector<1x64xf32> to vector<16x64xf32>
    %12 = arith.addf %9, %11 : vector<16x64xf32>
    %cst_11 = arith.constant 0.000000e+00 : f32
    %13 = vector.broadcast %cst_11 : f32 to vector<16x64xf32>
    %14 = arith.maximumf %12, %13 : vector<16x64xf32>
    %c0_12 = arith.constant 0 : index
    %c0_13 = arith.constant 0 : index
    %15 = vector.load %arg6[%c0_12, %c0_13] : memref<64x128xf32, #tpu.memory_space<vmem>>, vector<64x128xf32>
    %cst_14 = arith.constant dense<0.000000e+00> : vector<16x128xf32>
    %16 = tpu.matmul %14, %15, %cst_14 {dimension_numbers = #tpu.dot_dimension_numbers<[1], [0], [0], [1], [0, 0, 1, 1], [], []>} : vector<16x64xf32>, vector<64x128xf32>, vector<16x128xf32> -> vector<16x128xf32>
    %c0_15 = arith.constant 0 : index
    %c0_16 = arith.constant 0 : index
    %17 = vector.load %arg7[%c0_15, %c0_16] : memref<1x128xf32, #tpu.memory_space<vmem>>, vector<1x128xf32>
    %18 = vector.broadcast %17 : vector<1x128xf32> to vector<16x128xf32>
    %19 = arith.addf %16, %18 : vector<16x128xf32>
    %cst_17 = arith.constant dense<0xFF800000> : vector<16xf32>
    %20 = vector.multi_reduction <maximumf>, %19, %cst_17 [1] : vector<16x128xf32> to vector<16xf32>
    %21 = vector.shape_cast %20 : vector<16xf32> to vector<16x1xf32>
    %22 = vector.broadcast %21 : vector<16x1xf32> to vector<16x128xf32>
    %23 = arith.subf %19, %22 : vector<16x128xf32>
    %24 = math.exp %23 : vector<16x128xf32>
    %cst_18 = arith.constant dense<0.000000e+00> : vector<16xf32>
    %25 = vector.multi_reduction <add>, %24, %cst_18 [1] : vector<16x128xf32> to vector<16xf32>
    %26 = vector.shape_cast %25 : vector<16xf32> to vector<16x1xf32>
    %27 = tpu.reciprocal %26 {approx = true} : vector<16x1xf32> -> vector<16x1xf32>
    %28 = vector.broadcast %27 : vector<16x1xf32> to vector<16x128xf32>
    %29 = arith.mulf %24, %28 : vector<16x128xf32>
    %c0_19 = arith.constant 0 : index
    %c0_20 = arith.constant 0 : index
    %30 = vector.load %arg8[%c0_19, %c0_20] : memref<16x128xf32, #tpu.memory_space<vmem>>, vector<16x128xf32>
    tpu.vector_store %arg8[%c0_19, %c0_20], %29 {strides = array<i32>} : memref<16x128xf32, #tpu.memory_space<vmem>>, vector<16x128xf32>,
    return
  }
  func.func @transform_0(%arg0: i32) -> (i32, i32) {
    %c0_i32 = arith.constant 0 : i32
    %c0_i32_0 = arith.constant 0 : i32
    return %arg0, %c0_i32 : i32, i32
  }
  func.func @transform_1(%arg0: i32) -> (i32, i32) {
    %c0_i32 = arith.constant 0 : i32
    %c0_i32_0 = arith.constant 0 : i32
    %c0_i32_1 = arith.constant 0 : i32
    return %c0_i32, %c0_i32_0 : i32, i32
  }
  func.func @transform_2(%arg0: i32) -> (i32, i32) {
    %c0_i32 = arith.constant 0 : i32
    %c0_i32_0 = arith.constant 0 : i32
    %c0_i32_1 = arith.constant 0 : i32
    return %c0_i32, %c0_i32_0 : i32, i32
  }
  func.func @transform_3(%arg0: i32) -> (i32, i32) {
    %c0_i32 = arith.constant 0 : i32
    %c0_i32_0 = arith.constant 0 : i32
    %c0_i32_1 = arith.constant 0 : i32
    return %c0_i32, %c0_i32_0 : i32, i32
  }
  func.func @transform_4(%arg0: i32) -> (i32, i32) {
    %c0_i32 = arith.constant 0 : i32
    %c0_i32_0 = arith.constant 0 : i32
    %c0_i32_1 = arith.constant 0 : i32
    return %c0_i32, %c0_i32_0 : i32, i32
  }
  func.func @transform_5(%arg0: i32) -> (i32, i32) {
    %c0_i32 = arith.constant 0 : i32
    %c0_i32_0 = arith.constant 0 : i32
    %c0_i32_1 = arith.constant 0 : i32
    return %c0_i32, %c0_i32_0 : i32, i32
  }
  func.func @transform_6(%arg0: i32) -> (i32, i32) {
    %c0_i32 = arith.constant 0 : i32
    %c0_i32_0 = arith.constant 0 : i32
    %c0_i32_1 = arith.constant 0 : i32
    return %c0_i32, %c0_i32_0 : i32, i32
  }
  func.func @transform_7(%arg0: i32) -> (i32, i32) {
    %c0_i32 = arith.constant 0 : i32
    %c0_i32_0 = arith.constant 0 : i32
    return %arg0, %c0_i32 : i32, i32
  }
}

</mosaic_0001>

<bundles_post_ra>
// kernel: tpu_custom_call.1
= control target key start
LH: loop header
LB: loop body
LE: loop exit
PB: predicated region body
PF: predicated region fallthrough
CT: control target
= control target key end

     0   :  { %12 = vsyncpa [#allocation3], 0  ;;  %s1309_s0 = inlined_call_operand.vmem [shape: f32[48,16], index: 0, kind: input, shape index: {}]   ;;  %s1310_s1 = inlined_call_operand.hbm [shape: f32[16,64], index: 1, kind: input, shape index: {}]   ;;  %s1311_s2 = inlined_call_operand.vmem [shape: f32[1,64], index: 2, kind: input, shape index: {}]   ;;  %s1312_s3 = inlined_call_operand.vmem [shape: f32[64,64], index: 3, kind: input, shape index: {}]   ;;  %s1313_s4 = inlined_call_operand.vmem [shape: f32[1,64], index: 4, kind: input, shape index: {}]   ;;  %s1314_s5 = inlined_call_operand.hbm [shape: f32[64,128], index: 5, kind: input, shape index: {}]   ;;  %s1315_s6 = inlined_call_operand.vmem [shape: f32[1,128], index: 6, kind: input, shape index: {}]   ;;  %s1316_s7 = inlined_call_operand.hbm [shape: f32[48,128], index: 7, kind: output, shape index: {}]  }
   0x1   :  { %13 = vsyncpa [#allocation6], 0 }
   0x2   :  { %14 = vsyncpa [#allocation4], 0 }
   0x3   :  { %16 = vsyncpa [#allocation4 + $0x1], 0  ;;  %s1096_s24 = smov 0   ;;  %s1098_s25 = smov 0  }
   0x4   :  { %s1100_s26 = smov 0   ;;  %s1102_s27 = smov 0  }
   0x5 LB: > { %s1117_s28 = sadd.s32 4294967295, %s1047_s27   ;;  %s718_s29 = sadd.s32 4294967294, %s1047_s27   ;;  %s1047_s27 = sphi %s1102_s27, %s1336_s27   ;;  %s1043_s26 = sphi %s1100_s26, %s1335_s26   ;;  %s1039_s25 = sphi %s1098_s25, %s1334_s25   ;;  %s1035_s24 = sphi %s1096_s24, %s1333_s24  }
   0x6   : > { %s1121_s30 = sadd.s32 1, %s1047_s27   ;;  %s181_s8 = sadd.s32 1, %s1043_s26 }
   0x7   : > { %s178_s9 = ssub.s32 %s1047_s27, %s1121_s30  ;;  %p191_p0 = scmp.ne.s32.totalorder %s1043_s26, %s1039_s25 }
   0x8   : > { %p179_p1 = scmp.eq.s32.totalorder %s178_s9, 0  ;;  %p192_p2 = scmp.eq.s32.totalorder %s1117_s28, 2 }
   0x9   : > { %p197_p3 = scmp.ne.s32.totalorder %s1039_s25, %s1035_s24  ;;  %p198_p4 = scmp.eq.s32.totalorder %s718_s29, 2 }
   0xa   : > { %s1132_s10 = scalar_select %p179_p1, %s1043_s26, %s181_s8  }
   0xb   : > { %p1134_p5 = por %p192_p2, %p191_p0  ;;  %p1138_p6 = por %p198_p4, %p197_p3 }
   0xc   : > { %1320 = sst [smem:[#allocation11_spill]] %s1132_s10  ;;  %p719_p7 = scmp.ge.s32.totalorder %s1047_s27, 1 }
   0xd   : > { %s1321_s11 = scalar_select %p1134_p5, 1, 0 }
   0xe   : > { %s1322_s12 = scalar_select %p1138_p6, 1, 0 }
   0xf   : > { %p205_p8 = scmp.lt.s32.totalorder %s1047_s27, 4  ;;  %p1317_p9 = scmp.eq.s32.totalorder %s1117_s28, 0 }
  0x10   : > { %s1049_s14 = smov [#allocation2]   ;;  %s1050_s17 = smov [#allocation5]  }
  0x11   : > { %p1145_p10 = pnand %p719_p7, %p205_p8  ;;  %s217_s15 = sshll.u32 %s1049_s14, 4  ;;  %s218_s15 = int_to_ptr.vmem [resolvable:$true] %s217_s15 }
  0x12   : > { %s239_s18 = sshll.u32 %s1050_s17, 4  ;;  %s921_s21 = scalar_lea.hbm %s1310_s1, 256  ;;  %s1157_s18 = int_to_ptr.vmem [resolvable:$true] %s239_s18 }
  0x13   : > { %s1323_s13 = scalar_select %p1145_p10, 1, 0 }
  0x14   : > { %p859_p11 = pneg %p1145_p10  ;;  %p922_p13 = scmp.ne.s32.totalorder %s1310_s1, %s921_s21 }
  0x15   : > { %p928_p3 = scmp.lt.u32.totalorder %s921_s21, %s1310_s1 }
  0x16   : > { %p1153_p12 = pnand %p1317_p9, %p859_p11 }
  0x18   : > { %p923_p0 = pneg %p1153_p12 }
  0x1a   : > { %p924_p1 = pnand %p923_p0, %p922_p13 }
  0x1c   : > { %p925_p2 = pneg %p924_p1 }
  0x1e   : > { %p930_p4 = pnand %p928_p3, %p925_p2 }
  0x20   : > { %933 = shalt.err (!%p930_p4)
}
  0x21   : > { %s934_s9 = scalar_lea.vmem %s218_s15, 256  ;;  %p942_p9 = scmp.lt.s32.totalorder %s218_s15, %s218_s15 }
  0x22   : > { %p935_p7 = scmp.ne.s32.totalorder %s218_s15, %s934_s9  ;;  %p943_p6 = scmp.lt.s32.totalorder %s934_s9, %s934_s9 }
  0x24   : > { %p937_p8 = pnand %p935_p7, %p923_p0  ;;  %p944_p5 = por %p943_p6, %p942_p9 }
  0x26   : > { %p938_p11 = pneg %p937_p8 }
  0x28   : > { %p945_p10 = pnand %p944_p5, %p938_p11 }
  0x2a   : > { %948 = shalt.err (!%p945_p10)
}
  0x2b   : > { %s1051_s14 = smov 128   ;;  %s1052_s17 = smov 8  }
  0x2c   : > { %862 = dma.hbm_to_vmem [thread:$0]  (!%p1153_p12), %s1310_s1, 256, %s218_s15, [#allocation3], %s1051_s14, %s1051_s14, %s1052_s17  }
  0x2d   : > { %s949_s23 = scalar_lea.hbm %s1314_s5, 1024 }
  0x2e   : > { %p950_p13 = scmp.ne.s32.totalorder %s1314_s5, %s949_s23  ;;  %p956_p9 = scmp.lt.u32.totalorder %s949_s23, %s1314_s5 }
  0x30   : > { %p952_p5 = pnand %p950_p13, %p923_p0 }
  0x32   : > { %p953_p6 = pneg %p952_p5 }
  0x34   : > { %p958_p10 = pnand %p956_p9, %p953_p6 }
  0x36   : > { %961 = shalt.err (!%p958_p10)
}
  0x37   : > { %s962_s15 = scalar_lea.vmem %s1157_s18, 1024  ;;  %p970_p4 = scmp.lt.s32.totalorder %s1157_s18, %s1157_s18 }
  0x38   : > { %p963_p1 = scmp.ne.s32.totalorder %s1157_s18, %s962_s15  ;;  %p971_p7 = scmp.lt.s32.totalorder %s962_s15, %s962_s15 }
  0x3a   : > { %p965_p2 = pnand %p963_p1, %p923_p0  ;;  %p972_p8 = por %p971_p7, %p970_p4 }
  0x3c   : > { %p966_p3 = pneg %p965_p2 }
  0x3e   : > { %p973_p11 = pnand %p972_p8, %p966_p3 }
  0x40   : > { %976 = shalt.err (!%p973_p11)
}
  0x41   : > { %865 = dma.hbm_to_vmem [thread:$0]  (!%p1153_p12), %s1314_s5, 1024, %s1157_s18, [#allocation6], %s1051_s14, %s1051_s14, %s1052_s17  }
  0x42   : > { %p1325_p13 = scmp.ne.s32.totalorder %s1323_s13, 0 }
  0x43   : > { %p1326_p5 = scmp.eq.s32.totalorder (!%p1325_p13), %s1117_s28, 0 }
  0x44   : > { %267 = sbr.rel (%p1325_p13) target bundleno = 1070 (0x42e), region = 48 }
  0x4b   : > { %1022 = dma.done.wait (%p1326_p5), [#allocation3], 256   ;;  %p1327_p0 = pmov %p1326_p5 }
  0x4d   : > { %1024 = vsyncadd (%p1327_p0), [#allocation3], 4294967040  ;;  %p1328_p6 = pmov %p1327_p0 }
  0x4e   : > { %p1329_p9 = pmov %p1327_p0 }
  0x4f   : > { %1026 = dma.done.wait (%p1328_p6), [#allocation6], 1024  }
  0x50   : > { %1028 = vsyncadd (%p1329_p9), [#allocation6], 4294966272  ;;  %s727_s16 = sshll.u32 %s1117_s28, 1  ;;  %vm321_vm0 = vcmask 130048   ;;  %v312_v0 = vld [vmem:[#allocation2] sm:$0xff]  ;;  %v313_v1 = vld [vmem:[#allocation2 + $0x8] sm:$0xff] }
  0x51   : > { %p304_p10 = scmp.lt.s32.totalorder %s727_s16, 5  ;;  %v813_v3 = vpack.c.bf16 %v313_v1, %v312_v0  ;;  %v405_v4 = vld [vmem:[%s1312_s3] sm:$0xff]  ;;  %v406_v5 = vld [vmem:[%s1312_s3 + $0x8] sm:$0xff]  ;;  %v407_v7 = vld [vmem:[%s1312_s3 + $0x10] sm:$0xff]  ;;  %vm420_vm1 = vcmask 523264   ;;  %s300_s15 = sand.u32 1, %s1039_s25  }
  0x52   : > { %v817_v6 = vpack.c.bf16 %v406_v5, %v405_v4  ;;  %v408_v8 = vld [vmem:[%s1312_s3 + $0x18] sm:$0xff]  ;;  %v409_v10 = vld [vmem:[%s1312_s3 + $0x20] sm:$0xff]  ;;  %v410_v11 = vld [vmem:[%s1312_s3 + $0x28] sm:$0xff]  ;;  %s726_s10 = sshll.u32 %s300_s15, 4  ;;  %s743_s19 = sshll.u32 %s1117_s28, 8 }
  0x53   : > { %s1338_s16 = smov (!%p304_p10, %s727_s16), 5  ;;  %814 = vmatprep.subr.bf16.mxu0 %v813_v3  ;;  %v821_v9 = vpack.c.bf16 %v408_v8, %v407_v7  ;;  %v825_v13 = vpack.c.bf16 %v410_v11, %v409_v10  ;;  %v411_v14 = vld [vmem:[%s1312_s3 + $0x30] sm:$0xff]  ;;  %v412_v15 = vld [vmem:[%s1312_s3 + $0x38] sm:$0xff]  ;;  %v506_v19 = vld [vmem:[#allocation5 + $0x10] sm:$0xff]  ;;  %s1264_s20 = scalar_lea.hbm %s1316_s7, %s743_s19 }
  0x54   : > { %s728_s18 = sshll.u32 %s1338_s16, 3  ;;  %816 = vmatpush3.bf16.msra.mxu0 %v813_v3  ;;  %818 = vmatprep.subr.bf16.mxu1 %v817_v6  ;;  %v829_v16 = vpack.c.bf16 %v412_v15, %v411_v14  ;;  %v504_v17 = vld [vmem:[#allocation5] sm:$0xff]  ;;  %v505_v18 = vld [vmem:[#allocation5 + $0x8] sm:$0xff]  ;;  %v507_v21 = vld [vmem:[#allocation5 + $0x18] sm:$0xff]  ;;  %s302_s16 = scalar_lea.vmem [#allocation7], %s726_s10 }
  0x55   : > { %s307_s17 = scalar_lea.vmem %s1309_s0, %s728_s18  ;;  %820 = vmatpush3.bf16.msra.mxu1 %v817_v6  ;;  %v833_v20 = vpack.c.bf16 %v505_v18, %v504_v17  ;;  %v837_v22 = vpack.c.bf16 %v507_v21, %v506_v19  ;;  %v508_v23 = vld [vmem:[#allocation5 + $0x20] sm:$0xff]  ;;  %v509_v24 = vld [vmem:[#allocation5 + $0x28] sm:$0xff]  ;;  %v729_v26 = vld [vmem:[%s1311_s2] ss:$0 sm:$0xff]  ;;  %s634_s18 = sshll.u32 %s302_s16, 4  ;;  %s1266_s18 = int_to_ptr.vmem [resolvable:$true] %s634_s18 }
  0x56   : > { %v310_v2 = vld [vmem:[%s307_s17] sm:$0xff]  ;;  %v311_v12 = vld [vmem:[%s307_s17 + $0x8] sm:$0xff]  ;;  %822 = vmatprep.subr.bf16.mxu1 %v821_v9  ;;  %v841_v25 = vpack.c.bf16 %v509_v24, %v508_v23  ;;  %s1268_s21 = scalar_lea.sflag [#allocation4], %s300_s15  ;;  %s977_s17 = scalar_lea.vmem %s1266_s18, 256 }
  0x57   : > { %772 = vmatprep.mubr.msk.f32.mxu0 %vm321_vm0, %v310_v2  ;;  %834 = vmatprep.subr.bf16.mxu0 %v833_v20  ;;  %v510_v33 = vld [vmem:[#allocation5 + $0x30] sm:$0xff]  ;;  %v511_v34 = vld [vmem:[#allocation5 + $0x38] sm:$0xff]  ;;  %p978_p12 = scmp.ne.s32.totalorder %s1266_s18, %s977_s17  ;;  %p1330_p1 = scmp.ne.s32.totalorder %s1321_s11, 0 }
  0x58   : > { %773 = vmatmul.mubr.msk.f32.vlgmr.msra.gmra.mrb[0].mxu0 %vm321_vm0, %v311_v12  ;;  %v845_v35 = vpack.c.bf16 %v511_v34, %v510_v33  ;;  %v732_v36 = vld [vmem:[%s1313_s4] ss:$0 sm:$0xff]  ;;  %s1053_s28 = smov [#allocation7]  }
  0x59   : > { %824 = vmatpush3.bf16.msra.mxu1 %v821_v9  ;;  %836 = vmatpush3.bf16.msra.mxu0 %v833_v20  ;;  %v735_v43 = vld [vmem:[%s1315_s6] ss:$0 sm:$0xff]  ;;  %p979_p2 = pnand %p978_p12, %p1330_p1  ;;  %s981_s22 = sshll.u32 %s1053_s28, 4  ;;  %s982_s22 = int_to_ptr.vmem [resolvable:$false] %s981_s22 }
  0x5a   : > { %826 = vmatprep.subr.bf16.mxu1 %v825_v13  ;;  %838 = vmatprep.subr.bf16.mxu0 %v837_v22  ;;  %s983_s23 = scalar_lea.vmem %s982_s22, 512  ;;  %p984_p4 = scmp.lt.s32.totalorder %s1266_s18, %s982_s22 }
  0x5b   : > { %p980_p3 = pneg %p979_p2  ;;  %p985_p7 = scmp.lt.s32.totalorder %s983_s23, %s977_s17 }
  0x5d   : > { %828 = vmatpush3.bf16.msra.mxu1 %v825_v13  ;;  %840 = vmatpush3.bf16.msra.mxu0 %v837_v22  ;;  %p986_p8 = por %p985_p7, %p984_p4 }
  0x5e   : > { %830 = vmatprep.subr.bf16.mxu1 %v829_v16  ;;  %842 = vmatprep.subr.bf16.mxu0 %v841_v25 }
  0x5f   : > { %p987_p11 = pnand %p986_p8, %p980_p3 }
  0x61   : > { %832 = vmatpush3.bf16.msra.mxu1 %v829_v16  ;;  %844 = vmatpush3.bf16.msra.mxu0 %v841_v25 }
  0x62   : > { %846 = vmatprep.subr.bf16.mxu0 %v845_v35 }
  0x65   : > { %848 = vmatpush3.bf16.msra.mxu0 %v845_v35 }
 0x12b   : > { %v774_v27 = vpop.f32.mrb[0].mxu0 }
 0x12c   : > { %v400_v28 = vadd.f32 %v774_v27, %v729_v26  ;;  %v394_v29 = vpop.f32.mrb[1].mxu0 }
 0x12d   : > { %v395_v30 = vadd.f32 %v729_v26, %v394_v29 }
 0x12e   : > { %v404_v32 = vmax.f32 %v400_v28, 0.0 }
 0x12f   : > { %v403_v31 = vmax.f32 %v395_v30, 0.0 }
 0x131   : > { %791 = vmatprep.mubr.msk.f32.mxu1 %vm420_vm1, %v403_v31 }
 0x132   : > { %792 = vmatmul.mubr.msk.f32.vlgmr.msra.gmra.mrb[0].mxu1 %vm420_vm1, %v404_v32 }
 0x205   : > { %v793_v37 = vpop.f32.mrb[0].mxu1 }
 0x206   : > { %v499_v38 = vadd.f32 %v793_v37, %v732_v36  ;;  %v493_v39 = vpop.f32.mrb[1].mxu1 }
 0x207   : > { %v494_v40 = vadd.f32 %v732_v36, %v493_v39 }
 0x208   : > { %v503_v42 = vmax.f32 %v499_v38, 0.0 }
 0x209   : > { %v502_v41 = vmax.f32 %v494_v40, 0.0 }
 0x20b   : > { %810 = vmatprep.mubr.msk.f32.mxu0 %vm420_vm1, %v502_v41 }
 0x20c   : > { %811 = vmatmul.mubr.msk.f32.vlgmr.msra.gmra.mrb[2].mxu0 %vm420_vm1, %v503_v42 }
 0x2df   : > { %v812_v44 = vpop.f32.mrb[2].mxu0 }
 0x2e0   : > { %v591_v45 = vpop.f32.mrb[3].mxu0  ;;  %v597_v47 = vadd.f32 %v812_v44, %v735_v43 }
 0x2e1   : > { %v592_v46 = vadd.f32 %v735_v43, %v591_v45 }
 0x2e3   : > { %600 = vmax.xlane.f32.xlu0 %v592_v46 }
 0x2e7   : > { %602 = vmax.xlane.f32.xlu0 %v597_v47 }
 0x370   : > { %v601_v48 = vpop.xlane.xlu0 %600 }
 0x371   : > { %v604_v49 = vsub.f32 %v592_v46, %v601_v48 }
 0x373   : > { %v606_v50 = vmul.f32 1.442695, %v604_v49 }
 0x374   : > { %v603_v51 = vpop.xlane.xlu0 %602 }
 0x375   : > { %913 = vpow2.f32 %v606_v50  ;;  %v605_v52 = vsub.f32 %v597_v47, %v603_v51 }
 0x377   : > { %v608_v53 = vmul.f32 1.442695, %v605_v52 }
 0x379   : > { %915 = vpow2.f32 %v608_v53 }
 0x37f   : > { %v914_v54 = vpop.eup %913 }
 0x380   : > { %610 = vadd.xlane.f32.xlu1 %v914_v54 }
 0x383   : > { %v916_v55 = vpop.eup %915 }
 0x384   : > { %612 = vadd.xlane.f32.xlu1 %v916_v55 }
 0x40d   : > { %v611_v56 = vpop.xlane.xlu1 %610 }
 0x40e   : > { %917 = vrcp.f32 %v611_v56 }
 0x411   : > { %v613_v57 = vpop.xlane.xlu1 %612 }
 0x412   : > { %919 = vrcp.f32 %v613_v57 }
 0x418   : > { %v918_v58 = vpop.eup %917 }
 0x419   : > { %v616_v59 = vmul.f32 %v918_v58, %v914_v54 }
 0x41b   : > { %618 = vst [vmem:[%s302_s16] sm:$0xff] %v616_v59 }
 0x41c   : > { %v920_v60 = vpop.eup %919 }
 0x41d   : > { %v617_v61 = vmul.f32 %v920_v60, %v916_v55 }
 0x41f   : > { %619 = vst [vmem:[%s302_s16 + $0x8] sm:$0xff] %v617_v61 }
 0x420   : > { %990 = shalt.err (!%p987_p11)
}
 0x421   : > { %s991_s29 = scalar_lea.hbm %s1264_s20, 256  ;;  %s995_s15 = scalar_lea.hbm %s1316_s7, 768 }
 0x422   : > { %p992_p13 = scmp.ne.s32.totalorder %s1264_s20, %s991_s29  ;;  %p996_p6 = scmp.lt.u32.totalorder %s1264_s20, %s1316_s7 }
 0x423   : > { %p997_p9 = scmp.lt.u32.totalorder %s995_s15, %s991_s29  ;;  %p999_p12 = scmp.lt.u32.totalorder %s991_s29, %s1264_s20 }
 0x424   : > { %p993_p5 = pnand %p992_p13, %p1330_p1 }
 0x425   : > { %p998_p10 = por %p997_p9, %p996_p6 }
 0x426   : > { %p994_p0 = pneg %p993_p5 }
 0x427   : > { %p1000_p2 = por %p999_p12, %p998_p10 }
 0x429   : > { %p1001_p3 = pnand %p1000_p2, %p994_p0 }
 0x42b   : > { %1004 = shalt.err (!%p1001_p3)
}
 0x42c   : > { %s1054_s16 = smov 128   ;;  %s1055_s13 = smov 8  }
 0x42d   : > { %857 = dma.vmem_to_hbm [thread:$0]  (%p1330_p1), %s1266_s18, 256, %s1264_s20, %s1268_s21, %s1054_s16, %s1054_s16, %s1055_s13  }
 0x42e PF: > { %p874_p4 = scmp.ge.s32.totalorder %s1047_s27, 2  ;;  %s649_s14 = sand.u32 1, %s1035_s24  }
 0x42f   : > { %p1331_p7 = scmp.ne.s32.totalorder %s1322_s12, 0  ;;  %s650_s17 = scalar_lea.sflag [#allocation4], %s649_s14 }
 0x431   : > { %p867_p8 = pnand %p874_p4, %p1331_p7 }
 0x433   : > { %1030 = dma.done.wait (!%p867_p8), %s650_s17, 256  }
 0x434   : > { %1032 = vsyncadd (!%p867_p8), %s650_s17, 4294967040  ;;  %s1332_s28 = sld [smem:[#allocation11_spill]]  ;;  %p19_p11 = scmp.ge.s32.totalorder %s1121_s30, 5  }
 0x435   : > { %s1333_s24 = smov %s1039_s25  ;;  %s1334_s25 = smov %s1043_s26 }
 0x436   : > { %s1336_s27 = smov %s1121_s30  ;;  %21 = sbr.rel (!%p19_p11) target bundleno = 5 (0x5), region = 92 }
 0x43a   : > { %s1335_s26 = smov %s1332_s28 }
 0x43d   :  { %655 = vsyncpa [#allocation3], 1 }
 0x43e   :  { %657 = vsyncpa [#allocation3 + $0x1], 1 }
 0x43f   :  { %658 = vsyncpa [#allocation6], 1 }
 0x440   :  { %659 = vsyncpa [#allocation4], 1 }
 0x441   :  { %661 = vsyncpa [#allocation4 + $0x1], 1 }

</bundles_post_ra>
